<compile_context>
chip_gen: v7x
topology: tpu7x:2x2x1
jax: 0.10.0
libtpu: 0.0.40
codegen_flags: <defaults>
</compile_context>

<pallas_src>
import functools
import math

import jax
import jax.numpy as jnp
from jax import lax
from jax.experimental import pallas as pl
from jax.experimental.pallas import tpu as pltpu

_EPS = 1e-12  # torch.nn.functional.normalize default eps


def _cdiv(a, b):
    return -(-a // b)


def _round_up(x, m):
    return _cdiv(x, m) * m


def _l2_normalize(x, axis=-1):
    # matches torch F.normalize: x / max(||x||_2, eps)
    ssq = jnp.sum(jnp.square(x), axis=axis, keepdims=True)
    return x * lax.rsqrt(jnp.maximum(ssq, _EPS * _EPS))


def _signed_power(s, p_factor):
    """sign(s) * |s|^p, specialised at trace time (p is a Python constant)."""
    p = float(p_factor)
    if p.is_integer() and 1 <= int(p) <= 8:
        p_int = int(p)
        out = s
        for _ in range(p_int - 1):      # p=3 -> s*s*s, pure VPU multiplies
            out = out * s
        if p_int % 2 == 0:              # even powers lose the sign
            out = out * jnp.sign(s)
        return out
    # non-integer p: transcendental fallback (EUP)
    return jnp.power(jnp.abs(s), p_factor) * jnp.sign(s)


def _minerva_kernel(p_factor, fn_ref, efn_ref, exrep_ref, creps_ref, csq_ref,
                    logits_ref, echo_acc):
    k = pl.program_id(1)

    @pl.when(k == 0)
    def _init():
        echo_acc[...] = jnp.zeros_like(echo_acc)

    # cosine similarities vs this exemplar tile: (B_t, E_t), contract last dims
    s = lax.dot_general(fn_ref[...], efn_ref[...],
                        (((1,), (1,)), ((), ())),
                        preferred_element_type=jnp.float32)
    a = _signed_power(s, p_factor)
    # echo accumulation over the exemplar reduction axis; `a` is cast to the
    # MXU input dtype (bf16 by default) while accumulation stays f32.
    echo_acc[...] += lax.dot_general(a.astype(exrep_ref.dtype), exrep_ref[...],
                                     (((1,), (0,)), ((), ())),
                                     preferred_element_type=jnp.float32)

    @pl.when(k == pl.num_programs(1) - 1)
    def _finalize():
        echo = echo_acc[...]
        # logits = -cdist(echo, class_reps) via Gram expansion (f32 throughout)
        e_sq = jnp.sum(echo * echo, axis=-1, keepdims=True)          # (B_t, 1)
        cross = lax.dot_general(echo, creps_ref[...],
                                (((1,), (1,)), ((), ())),
                                preferred_element_type=jnp.float32)  # (B_t, L)
        d2 = jnp.maximum(e_sq + csq_ref[...] - 2.0 * cross, 0.0)
        logits_ref[...] = -jnp.sqrt(d2)


def _tpu_info():
    """(is_v7x, physical VMEM bytes per core) from the device kind string."""
    kind = ""
    try:
        kind = jax.devices()[0].device_kind.lower()
    except Exception:
        pass
    is_v7 = "v7" in kind
    if is_v7:
        phys_vmem = 64 * 1024 * 1024
    elif ("v5" in kind) or ("v6" in kind) or ("v4" in kind):
        phys_vmem = 128 * 1024 * 1024
    else:
        phys_vmem = 64 * 1024 * 1024    # conservative default
    return is_v7, phys_vmem


def _pick_tile(n, cap, align=8, min_tiles=1):
    """Tile <= cap (aligned) with minimal padding; at least `min_tiles` tiles."""
    n = max(int(n), 1)
    cap = max(_round_up(int(cap), align), align)
    n_tiles = max(int(min_tiles), _cdiv(n, cap))
    tile = min(_round_up(_cdiv(n, n_tiles), align), cap)
    return max(tile, align)


def _vmem_estimate(b_tile, ex_tile, F_pad, C_pad, L_pad, in_isz):
    streamed = 2 * ex_tile * (F_pad + C_pad) * in_isz   # efn + exrep (2 bufs)
    fn_blk = 2 * b_tile * F_pad * in_isz                # fn (2 bufs)
    consts = L_pad * C_pad * 4 + L_pad * 4              # class_reps + csq
    out_blk = 2 * b_tile * L_pad * 4                    # logits (2 bufs)
    scratch = b_tile * C_pad * 4                        # echo accumulator
    inter = b_tile * ex_tile * (4 + in_isz)             # s (f32) + cast of a
    return streamed + fn_blk + consts + out_blk + scratch + inter


@functools.partial(jax.jit,
                   static_argnames=("p_factor", "use_bf16_matmul",
                                    "single_buffer_consts"))
def _minerva_forward_impl(features, ex_features, ex_classes, g_weight,
                          class_reps, *, p_factor, use_bf16_matmul,
                          single_buffer_consts):
    B, _ = features.shape
    num_ex = ex_features.shape[0]
    feat_dim = g_weight.shape[0]
    num_labels, class_dim = class_reps.shape
    f32 = jnp.float32
    in_dtype = jnp.bfloat16 if use_bf16_matmul else f32
    in_isz = 2 if use_bf16_matmul else 4

    # ---- projection / exemplar precompute hoisted to XLA (f32) -------------
    gT = g_weight.astype(f32).T
    fn = _l2_normalize(features.astype(f32) @ gT)                 # (B, F)
    efn = _l2_normalize(ex_features.astype(f32) @ gT)             # (num_ex, F)
    exrep = _l2_normalize(ex_classes.astype(f32)) @ class_reps.astype(f32)
    class_sq = jnp.sum(jnp.square(class_reps.astype(f32)), axis=-1)[None, :]

    # ---- tiling (lane dims to 128; minimal-padding row tiles) ---------------
    LANE = 128
    F_pad = _round_up(feat_dim, LANE)
    C_pad = _round_up(class_dim, LANE)
    L_pad = _round_up(num_labels, LANE)

    is_v7, phys_vmem = _tpu_info()
    vmem_budget = min(phys_vmem - 8 * 1024 * 1024, 112 * 1024 * 1024)
    tile_budget = int(vmem_budget * 0.8)       # compiler-scratch headroom

    b_cap = 512 if is_v7 else 1024             # big batch tiles: fewer efn/exrep re-streams
    min_b_tiles = 2 if (is_v7 and B >= 16) else 1   # keep both v7x TCs busy
    b_tile = _pick_tile(B, b_cap, 8, min_b_tiles)
    ex_tile = _pick_tile(num_ex, 2048, 8)      # long reduction tiles, fewer grid steps

    for _ in range(64):
        if _vmem_estimate(b_tile, ex_tile, F_pad, C_pad, L_pad, in_isz) <= tile_budget:
            break
        if ex_tile > 256:                      # shrink ex_tile first: b_tile is the HBM lever
            ex_tile = _pick_tile(num_ex, max(8, _round_up(ex_tile // 2, 8)), 8)
        elif b_tile > 64:
            b_tile = _pick_tile(B, max(8, _round_up(b_tile // 2, 8)), 8, min_b_tiles)
        elif ex_tile > 8:
            ex_tile = _pick_tile(num_ex, max(8, _round_up(ex_tile // 2, 8)), 8)
        elif b_tile > 8:
            b_tile = _pick_tile(B, max(8, _round_up(b_tile // 2, 8)), 8, min_b_tiles)
        else:
            break

    n_b = _cdiv(B, b_tile)
    n_e = _cdiv(num_ex, ex_tile)
    B_pad = n_b * b_tile
    E_pad = n_e * ex_tile

    def _pad2(x, r, c):
        return jnp.pad(x, ((0, r - x.shape[0]), (0, c - x.shape[1])))

    fn_p = _pad2(fn, B_pad, F_pad).astype(in_dtype)
    efn_p = _pad2(efn, E_pad, F_pad).astype(in_dtype)
    exrep_p = _pad2(exrep, E_pad, C_pad).astype(in_dtype)   # bf16 in default path
    creps_p = _pad2(class_reps.astype(f32), L_pad, C_pad)
    csq_p = _pad2(class_sq, 1, L_pad)

    # ---- cost hints (bytes include the n_b-fold re-streaming of efn/exrep) --
    flops = (2 * B_pad * E_pad * (F_pad + C_pad)     # similarities + echo
             + 2 * B_pad * C_pad * L_pad             # cdist cross-term
             + 2 * B_pad * E_pad)                    # p=3 activation muls
    transcendentals = B_pad * L_pad                  # sqrt per logit
    bytes_accessed = (B_pad * F_pad * in_isz
                      + n_b * E_pad * (F_pad + C_pad) * in_isz
                      + L_pad * C_pad * 4 + L_pad * 4
                      + B_pad * L_pad * 4)

    # ---- BlockSpecs ----------------------------------------------------------
    def _const_spec(shape):
        idx = lambda i, k: tuple(0 for _ in shape)
        if single_buffer_consts:
            # grid-invariant blocks: single buffer frees VMEM for bigger tiles
            return pl.BlockSpec(shape, idx, pipeline_mode=pl.Buffered(1))
        return pl.BlockSpec(shape, idx)

    in_specs = [
        pl.BlockSpec((b_tile, F_pad), lambda i, k: (i, 0)),    # fn (per batch tile)
        pl.BlockSpec((ex_tile, F_pad), lambda i, k: (k, 0)),   # efn (streamed)
        pl.BlockSpec((ex_tile, C_pad), lambda i, k: (k, 0)),   # ex_class_reps (streamed)
        _const_spec((L_pad, C_pad)),                           # class_reps
        _const_spec((1, L_pad)),                               # ||class_reps||^2
    ]

    kernel = functools.partial(_minerva_kernel, float(p_factor))
    logits_pad = pl.pallas_call(
        kernel,
        out_shape=jax.ShapeDtypeStruct((B_pad, L_pad), f32),
        grid_spec=pltpu.PrefetchScalarGridSpec(
            num_scalar_prefetch=0,
            grid=(n_b, n_e),
            in_specs=in_specs,
            out_specs=pl.BlockSpec((b_tile, L_pad), lambda i, k: (i, 0)),
            scratch_shapes=[pltpu.VMEM((b_tile, C_pad), jnp.float32)],  # echo acc
        ),
        compiler_params=pltpu.CompilerParams(
            dimension_semantics=("parallel", "arbitrary"),
            vmem_limit_bytes=int(vmem_budget),
        ),
        cost_estimate=pl.CostEstimate(
            flops=int(flops),
            transcendentals=int(transcendentals),
            bytes_accessed=int(bytes_accessed),
        ),
    )(fn_p, efn_p, exrep_p, creps_p, csq_p)

    return logits_pad[:B, :num_labels]


def minerva_forward(features, ex_features, ex_classes, g_weight, class_reps,
                    *, p_factor=3.0, use_bf16_matmul=True):
    """Public entry point. bf16 MXU operands by default (f32 accumulation)."""
    kwargs = dict(p_factor=float(p_factor),
                  use_bf16_matmul=bool(use_bf16_matmul))
    try:
        return _minerva_forward_impl(features, ex_features, ex_classes,
                                     g_weight, class_reps,
                                     single_buffer_consts=True, **kwargs)
    except Exception:
        # Installed Pallas may reject pipeline_mode=pl.Buffered(1) on a
        # grid-based pallas_call; retry with default double buffering.
        return _minerva_forward_impl(features, ex_features, ex_classes,
                                     g_weight, class_reps,
                                     single_buffer_consts=False, **kwargs)


def _reference(features, ex_features, ex_classes, g_weight, class_reps, p_factor):
    """Pure-jnp reference of the PyTorch forward (labels=None path)."""
    f = features @ g_weight.T
    ef = ex_features @ g_weight.T
    fn = _l2_normalize(f)
    efn = _l2_normalize(ef)
    s = fn @ efn.T
    a = jnp.power(jnp.abs(s), p_factor) * jnp.sign(s)
    ecr = _l2_normalize(ex_classes) @ class_reps
    echo = a @ ecr
    diff = echo[:, None, :] - class_reps[None, :, :]
    return -jnp.sqrt(jnp.sum(diff * diff, axis=-1))


if __name__ == "__main__":
    key = jax.random.PRNGKey(0)
    B, input_dim, feat_dim, num_ex, num_labels = 8, 32, 32, 16, 8
    k1, k2, k3, k4 = jax.random.split(key, 4)

    features = jax.random.normal(k1, (B, input_dim), dtype=jnp.float32)
    ex_features = jax.random.normal(k2, (num_ex, input_dim), dtype=jnp.float32)
    ex_classes = jax.nn.one_hot(
        jax.random.randint(k3, (num_ex,), 0, num_labels),
        num_labels, dtype=jnp.float32)

    # g = nn.Linear(input_dim, feat_dim, bias=False): uniform(-1/sqrt(in), 1/sqrt(in))
    bound = 1.0 / math.sqrt(input_dim)
    g_weight = jax.random.uniform(k4, (feat_dim, input_dim), jnp.float32,
                                  minval=-bound, maxval=bound)
    # args.class_dim is None -> class_reps = one_hot(arange(num_labels)).float()
    class_reps = jnp.eye(num_labels, dtype=jnp.float32)

    ref = _reference(features, ex_features, ex_classes, g_weight, class_reps, 3.0)

    # default (bf16 MXU operand) path
    logits = minerva_forward(features, ex_features, ex_classes, g_weight,
                             class_reps, p_factor=3.0)
    jax.block_until_ready(logits)
    assert logits.shape == (B, num_labels)
    assert bool(jnp.all(jnp.isfinite(logits)))
    assert bool(jnp.allclose(logits, ref, atol=5e-2, rtol=5e-2)), (
        "bf16 max abs err = %s" % float(jnp.max(jnp.abs(logits - ref))))

    # full f32 path (accuracy check against the reference)
    logits_f32 = minerva_forward(features, ex_features, ex_classes, g_weight,
                                 class_reps, p_factor=3.0,
                                 use_bf16_matmul=False)
    jax.block_until_ready(logits_f32)
    assert bool(jnp.all(jnp.isfinite(logits_f32)))
    assert bool(jnp.allclose(logits_f32, ref, atol=5e-3, rtol=5e-3)), (
        "f32 max abs err = %s" % float(jnp.max(jnp.abs(logits_f32 - ref))))

    print("KERNEL_OK")
</pallas_src>

<mosaic_0001>
module attributes {stable_mosaic.version = 11 : i64} {
  func.func @_minerva_kernel(%arg0: i32, %arg1: i32, %arg2: memref<8x128xbf16, #tpu.memory_space<vmem>>, %arg3: memref<16x128xbf16, #tpu.memory_space<vmem>>, %arg4: memref<16x128xbf16, #tpu.memory_space<vmem>>, %arg5: memref<128x128xf32, #tpu.memory_space<vmem>>, %arg6: memref<1x128xf32, #tpu.memory_space<vmem>>, %arg7: memref<8x128xf32, #tpu.memory_space<vmem>>, %arg8: memref<8x128xf32, #tpu.memory_space<vmem>>) attributes {dimension_semantics = [#tpu.dimension_semantics<parallel>, #tpu.dimension_semantics<arbitrary>], iteration_bounds = array<i64: 1, 1>, scalar_prefetch = 0 : i64, scratch_operands = 1 : i64, tpu.core_type = #tpu.core_type<tc>, window_params = [{transform_indices = @transform_0, window_bounds = array<i64: 8, 128>}, {transform_indices = @transform_1, window_bounds = array<i64: 16, 128>}, {transform_indices = @transform_2, window_bounds = array<i64: 16, 128>}, {pipeline_mode = #tpu.pipeline_mode<synchronous>, transform_indices = @transform_3, window_bounds = array<i64: 128, 128>}, {pipeline_mode = #tpu.pipeline_mode<synchronous>, transform_indices = @transform_4, window_bounds = array<i64: 1, 128>}, {transform_indices = @transform_5, window_bounds = array<i64: 8, 128>}]} {
    %c0_i32 = arith.constant 0 : i32
    %0 = arith.cmpi eq, %arg1, %c0_i32 : i32
    %1 = arith.extui %0 : i1 to i32
    %c0_i32_0 = arith.constant 0 : i32
    %2 = arith.cmpi ne, %1, %c0_i32_0 : i32
    scf.if %2 {
      %cst_13 = arith.constant 0.000000e+00 : f32
      %17 = vector.broadcast %cst_13 : f32 to vector<8x128xf32>
      %c0_14 = arith.constant 0 : index
      %c0_15 = arith.constant 0 : index
      %18 = vector.load %arg8[%c0_14, %c0_15] : memref<8x128xf32, #tpu.memory_space<vmem>>, vector<8x128xf32>
      tpu.vector_store %arg8[%c0_14, %c0_15], %17 {strides = array<i32>} : memref<8x128xf32, #tpu.memory_space<vmem>>, vector<8x128xf32>,
    } else {
    }
    %c0 = arith.constant 0 : index
    %c0_1 = arith.constant 0 : index
    %3 = vector.load %arg2[%c0, %c0_1] : memref<8x128xbf16, #tpu.memory_space<vmem>>, vector<8x128xbf16>
    %c0_2 = arith.constant 0 : index
    %c0_3 = arith.constant 0 : index
    %4 = vector.load %arg3[%c0_2, %c0_3] : memref<16x128xbf16, #tpu.memory_space<vmem>>, vector<16x128xbf16>
    %cst = arith.constant dense<0.000000e+00> : vector<8x16xf32>
    %5 = tpu.matmul %3, %4, %cst {dimension_numbers = #tpu.dot_dimension_numbers<[1], [1], [0], [0], [0, 0, 1, 0], [], []>} : vector<8x128xbf16>, vector<16x128xbf16>, vector<8x16xf32> -> vector<8x16xf32>
    %6 = arith.mulf %5, %5 : vector<8x16xf32>
    %7 = arith.mulf %6, %5 : vector<8x16xf32>
    %c0_4 = arith.constant 0 : index
    %c0_5 = arith.constant 0 : index
    %8 = vector.load %arg8[%c0_4, %c0_5] : memref<8x128xf32, #tpu.memory_space<vmem>>, vector<8x128xf32>
    %9 = arith.truncf %7 : vector<8x16xf32> to vector<8x16xbf16>
    %c0_6 = arith.constant 0 : index
    %c0_7 = arith.constant 0 : index
    %10 = vector.load %arg4[%c0_6, %c0_7] : memref<16x128xbf16, #tpu.memory_space<vmem>>, vector<16x128xbf16>
    %cst_8 = arith.constant dense<0.000000e+00> : vector<8x128xf32>
    %11 = tpu.matmul %9, %10, %cst_8 {dimension_numbers = #tpu.dot_dimension_numbers<[1], [0], [0], [1], [0, 0, 1, 1], [], []>} : vector<8x16xbf16>, vector<16x128xbf16>, vector<8x128xf32> -> vector<8x128xf32>
    %12 = arith.addf %8, %11 : vector<8x128xf32>
    %c0_9 = arith.constant 0 : index
    %c0_10 = arith.constant 0 : index
    %13 = vector.load %arg8[%c0_9, %c0_10] : memref<8x128xf32, #tpu.memory_space<vmem>>, vector<8x128xf32>
    tpu.vector_store %arg8[%c0_9, %c0_10], %12 {strides = array<i32>} : memref<8x128xf32, #tpu.memory_space<vmem>>, vector<8x128xf32>,
    %c0_i32_11 = arith.constant 0 : i32
    %14 = arith.cmpi eq, %arg1, %c0_i32_11 : i32
    %15 = arith.extui %14 : i1 to i32
    %c0_i32_12 = arith.constant 0 : i32
    %16 = arith.cmpi ne, %15, %c0_i32_12 : i32
    scf.if %16 {
      %c0_13 = arith.constant 0 : index
      %c0_14 = arith.constant 0 : index
      %17 = vector.load %arg8[%c0_13, %c0_14] : memref<8x128xf32, #tpu.memory_space<vmem>>, vector<8x128xf32>
      %18 = arith.mulf %17, %17 : vector<8x128xf32>
      %cst_15 = arith.constant dense<0.000000e+00> : vector<8xf32>
      %19 = vector.multi_reduction <add>, %18, %cst_15 [1] : vector<8x128xf32> to vector<8xf32>
      %20 = vector.shape_cast %19 : vector<8xf32> to vector<8x1xf32>
      %c0_16 = arith.constant 0 : index
      %c0_17 = arith.constant 0 : index
      %21 = vector.load %arg5[%c0_16, %c0_17] : memref<128x128xf32, #tpu.memory_space<vmem>>, vector<128x128xf32>
      %cst_18 = arith.constant dense<0.000000e+00> : vector<8x128xf32>
      %22 = tpu.matmul %17, %21, %cst_18 {dimension_numbers = #tpu.dot_dimension_numbers<[1], [1], [0], [0], [0, 0, 1, 0], [], []>} : vector<8x128xf32>, vector<128x128xf32>, vector<8x128xf32> -> vector<8x128xf32>
      %c0_19 = arith.constant 0 : index
      %c0_20 = arith.constant 0 : index
      %23 = vector.load %arg6[%c0_19, %c0_20] : memref<1x128xf32, #tpu.memory_space<vmem>>, vector<1x128xf32>
      %24 = vector.broadcast %20 : vector<8x1xf32> to vector<8x128xf32>
      %25 = vector.broadcast %23 : vector<1x128xf32> to vector<8x128xf32>
      %26 = arith.addf %24, %25 : vector<8x128xf32>
      %cst_21 = arith.constant 2.000000e+00 : f32
      %27 = vector.broadcast %cst_21 : f32 to vector<8x128xf32>
      %28 = arith.mulf %27, %22 : vector<8x128xf32>
      %29 = arith.subf %26, %28 : vector<8x128xf32>
      %cst_22 = arith.constant 0.000000e+00 : f32
      %30 = vector.broadcast %cst_22 : f32 to vector<8x128xf32>
      %31 = arith.maximumf %29, %30 : vector<8x128xf32>
      %32 = math.sqrt %31 : vector<8x128xf32>
      %cst_23 = arith.constant 0.000000e+00 : f32
      %33 = vector.broadcast %cst_23 : f32 to vector<8x128xf32>
      %34 = arith.subf %33, %32 : vector<8x128xf32>
      %c0_24 = arith.constant 0 : index
      %c0_25 = arith.constant 0 : index
      %35 = vector.load %arg7[%c0_24, %c0_25] : memref<8x128xf32, #tpu.memory_space<vmem>>, vector<8x128xf32>
      tpu.vector_store %arg7[%c0_24, %c0_25], %34 {strides = array<i32>} : memref<8x128xf32, #tpu.memory_space<vmem>>, vector<8x128xf32>,
    } else {
    }
    return
  }
  func.func @transform_0(%arg0: i32, %arg1: i32) -> (i32, i32) {
    %c0_i32 = arith.constant 0 : i32
    %c0_i32_0 = arith.constant 0 : i32
    return %arg0, %c0_i32 : i32, i32
  }
  func.func @transform_1(%arg0: i32, %arg1: i32) -> (i32, i32) {
    %c0_i32 = arith.constant 0 : i32
    %c0_i32_0 = arith.constant 0 : i32
    return %arg1, %c0_i32 : i32, i32
  }
  func.func @transform_2(%arg0: i32, %arg1: i32) -> (i32, i32) {
    %c0_i32 = arith.constant 0 : i32
    %c0_i32_0 = arith.constant 0 : i32
    return %arg1, %c0_i32 : i32, i32
  }
  func.func @transform_3(%arg0: i32, %arg1: i32) -> (i32, i32) {
    %c0_i32 = arith.constant 0 : i32
    %c0_i32_0 = arith.constant 0 : i32
    %c0_i32_1 = arith.constant 0 : i32
    return %c0_i32, %c0_i32_0 : i32, i32
  }
  func.func @transform_4(%arg0: i32, %arg1: i32) -> (i32, i32) {
    %c0_i32 = arith.constant 0 : i32
    %c0_i32_0 = arith.constant 0 : i32
    %c0_i32_1 = arith.constant 0 : i32
    return %c0_i32, %c0_i32_0 : i32, i32
  }
  func.func @transform_5(%arg0: i32, %arg1: i32) -> (i32, i32) {
    %c0_i32 = arith.constant 0 : i32
    %c0_i32_0 = arith.constant 0 : i32
    return %arg0, %c0_i32 : i32, i32
  }
}

module attributes {stable_mosaic.version = 11 : i64} {
  func.func @_minerva_kernel(%arg0: i32, %arg1: i32, %arg2: memref<8x128xbf16, #tpu.memory_space<vmem>>, %arg3: memref<16x128xbf16, #tpu.memory_space<vmem>>, %arg4: memref<16x128xbf16, #tpu.memory_space<vmem>>, %arg5: memref<128x128xf32, #tpu.memory_space<vmem>>, %arg6: memref<1x128xf32, #tpu.memory_space<vmem>>, %arg7: memref<8x128xf32, #tpu.memory_space<vmem>>, %arg8: memref<8x128xf32, #tpu.memory_space<vmem>>) attributes {dimension_semantics = [#tpu.dimension_semantics<parallel>, #tpu.dimension_semantics<arbitrary>], iteration_bounds = array<i64: 1, 1>, scalar_prefetch = 0 : i64, scratch_operands = 1 : i64, tpu.core_type = #tpu.core_type<tc>, window_params = [{transform_indices = @transform_0, window_bounds = array<i64: 8, 128>}, {transform_indices = @transform_1, window_bounds = array<i64: 16, 128>}, {transform_indices = @transform_2, window_bounds = array<i64: 16, 128>}, {pipeline_mode = #tpu.pipeline_mode<synchronous>, transform_indices = @transform_3, window_bounds = array<i64: 128, 128>}, {pipeline_mode = #tpu.pipeline_mode<synchronous>, transform_indices = @transform_4, window_bounds = array<i64: 1, 128>}, {transform_indices = @transform_5, window_bounds = array<i64: 8, 128>}]} {
    %c0_i32 = arith.constant 0 : i32
    %0 = arith.cmpi eq, %arg1, %c0_i32 : i32
    %1 = arith.extui %0 : i1 to i32
    %c0_i32_0 = arith.constant 0 : i32
    %2 = arith.cmpi ne, %1, %c0_i32_0 : i32
    scf.if %2 {
      %cst_13 = arith.constant 0.000000e+00 : f32
      %17 = vector.broadcast %cst_13 : f32 to vector<8x128xf32>
      %c0_14 = arith.constant 0 : index
      %c0_15 = arith.constant 0 : index
      %18 = vector.load %arg8[%c0_14, %c0_15] : memref<8x128xf32, #tpu.memory_space<vmem>>, vector<8x128xf32>
      tpu.vector_store %arg8[%c0_14, %c0_15], %17 {strides = array<i32>} : memref<8x128xf32, #tpu.memory_space<vmem>>, vector<8x128xf32>,
    } else {
    }
    %c0 = arith.constant 0 : index
    %c0_1 = arith.constant 0 : index
    %3 = vector.load %arg2[%c0, %c0_1] : memref<8x128xbf16, #tpu.memory_space<vmem>>, vector<8x128xbf16>
    %c0_2 = arith.constant 0 : index
    %c0_3 = arith.constant 0 : index
    %4 = vector.load %arg3[%c0_2, %c0_3] : memref<16x128xbf16, #tpu.memory_space<vmem>>, vector<16x128xbf16>
    %cst = arith.constant dense<0.000000e+00> : vector<8x16xf32>
    %5 = tpu.matmul %3, %4, %cst {dimension_numbers = #tpu.dot_dimension_numbers<[1], [1], [0], [0], [0, 0, 1, 0], [], []>} : vector<8x128xbf16>, vector<16x128xbf16>, vector<8x16xf32> -> vector<8x16xf32>
    %6 = arith.mulf %5, %5 : vector<8x16xf32>
    %7 = arith.mulf %6, %5 : vector<8x16xf32>
    %c0_4 = arith.constant 0 : index
    %c0_5 = arith.constant 0 : index
    %8 = vector.load %arg8[%c0_4, %c0_5] : memref<8x128xf32, #tpu.memory_space<vmem>>, vector<8x128xf32>
    %9 = arith.truncf %7 : vector<8x16xf32> to vector<8x16xbf16>
    %c0_6 = arith.constant 0 : index
    %c0_7 = arith.constant 0 : index
    %10 = vector.load %arg4[%c0_6, %c0_7] : memref<16x128xbf16, #tpu.memory_space<vmem>>, vector<16x128xbf16>
    %cst_8 = arith.constant dense<0.000000e+00> : vector<8x128xf32>
    %11 = tpu.matmul %9, %10, %cst_8 {dimension_numbers = #tpu.dot_dimension_numbers<[1], [0], [0], [1], [0, 0, 1, 1], [], []>} : vector<8x16xbf16>, vector<16x128xbf16>, vector<8x128xf32> -> vector<8x128xf32>
    %12 = arith.addf %8, %11 : vector<8x128xf32>
    %c0_9 = arith.constant 0 : index
    %c0_10 = arith.constant 0 : index
    %13 = vector.load %arg8[%c0_9, %c0_10] : memref<8x128xf32, #tpu.memory_space<vmem>>, vector<8x128xf32>
    tpu.vector_store %arg8[%c0_9, %c0_10], %12 {strides = array<i32>} : memref<8x128xf32, #tpu.memory_space<vmem>>, vector<8x128xf32>,
    %c0_i32_11 = arith.constant 0 : i32
    %14 = arith.cmpi eq, %arg1, %c0_i32_11 : i32
    %15 = arith.extui %14 : i1 to i32
    %c0_i32_12 = arith.constant 0 : i32
    %16 = arith.cmpi ne, %15, %c0_i32_12 : i32
    scf.if %16 {
      %c0_13 = arith.constant 0 : index
      %c0_14 = arith.constant 0 : index
      %17 = vector.load %arg8[%c0_13, %c0_14] : memref<8x128xf32, #tpu.memory_space<vmem>>, vector<8x128xf32>
      %18 = arith.mulf %17, %17 : vector<8x128xf32>
      %cst_15 = arith.constant dense<0.000000e+00> : vector<8xf32>
      %19 = vector.multi_reduction <add>, %18, %cst_15 [1] : vector<8x128xf32> to vector<8xf32>
      %20 = vector.shape_cast %19 : vector<8xf32> to vector<8x1xf32>
      %c0_16 = arith.constant 0 : index
      %c0_17 = arith.constant 0 : index
      %21 = vector.load %arg5[%c0_16, %c0_17] : memref<128x128xf32, #tpu.memory_space<vmem>>, vector<128x128xf32>
      %cst_18 = arith.constant dense<0.000000e+00> : vector<8x128xf32>
      %22 = tpu.matmul %17, %21, %cst_18 {dimension_numbers = #tpu.dot_dimension_numbers<[1], [1], [0], [0], [0, 0, 1, 0], [], []>} : vector<8x128xf32>, vector<128x128xf32>, vector<8x128xf32> -> vector<8x128xf32>
      %c0_19 = arith.constant 0 : index
      %c0_20 = arith.constant 0 : index
      %23 = vector.load %arg6[%c0_19, %c0_20] : memref<1x128xf32, #tpu.memory_space<vmem>>, vector<1x128xf32>
      %24 = vector.broadcast %20 : vector<8x1xf32> to vector<8x128xf32>
      %25 = vector.broadcast %23 : vector<1x128xf32> to vector<8x128xf32>
      %26 = arith.addf %24, %25 : vector<8x128xf32>
      %cst_21 = arith.constant 2.000000e+00 : f32
      %27 = vector.broadcast %cst_21 : f32 to vector<8x128xf32>
      %28 = arith.mulf %27, %22 : vector<8x128xf32>
      %29 = arith.subf %26, %28 : vector<8x128xf32>
      %cst_22 = arith.constant 0.000000e+00 : f32
      %30 = vector.broadcast %cst_22 : f32 to vector<8x128xf32>
      %31 = arith.maximumf %29, %30 : vector<8x128xf32>
      %32 = math.sqrt %31 : vector<8x128xf32>
      %cst_23 = arith.constant 0.000000e+00 : f32
      %33 = vector.broadcast %cst_23 : f32 to vector<8x128xf32>
      %34 = arith.subf %33, %32 : vector<8x128xf32>
      %c0_24 = arith.constant 0 : index
      %c0_25 = arith.constant 0 : index
      %35 = vector.load %arg7[%c0_24, %c0_25] : memref<8x128xf32, #tpu.memory_space<vmem>>, vector<8x128xf32>
      tpu.vector_store %arg7[%c0_24, %c0_25], %34 {strides = array<i32>} : memref<8x128xf32, #tpu.memory_space<vmem>>, vector<8x128xf32>,
    } else {
    }
    return
  }
  func.func @transform_0(%arg0: i32, %arg1: i32) -> (i32, i32) {
    %c0_i32 = arith.constant 0 : i32
    %c0_i32_0 = arith.constant 0 : i32
    return %arg0, %c0_i32 : i32, i32
  }
  func.func @transform_1(%arg0: i32, %arg1: i32) -> (i32, i32) {
    %c0_i32 = arith.constant 0 : i32
    %c0_i32_0 = arith.constant 0 : i32
    return %arg1, %c0_i32 : i32, i32
  }
  func.func @transform_2(%arg0: i32, %arg1: i32) -> (i32, i32) {
    %c0_i32 = arith.constant 0 : i32
    %c0_i32_0 = arith.constant 0 : i32
    return %arg1, %c0_i32 : i32, i32
  }
  func.func @transform_3(%arg0: i32, %arg1: i32) -> (i32, i32) {
    %c0_i32 = arith.constant 0 : i32
    %c0_i32_0 = arith.constant 0 : i32
    %c0_i32_1 = arith.constant 0 : i32
    return %c0_i32, %c0_i32_0 : i32, i32
  }
  func.func @transform_4(%arg0: i32, %arg1: i32) -> (i32, i32) {
    %c0_i32 = arith.constant 0 : i32
    %c0_i32_0 = arith.constant 0 : i32
    %c0_i32_1 = arith.constant 0 : i32
    return %c0_i32, %c0_i32_0 : i32, i32
  }
  func.func @transform_5(%arg0: i32, %arg1: i32) -> (i32, i32) {
    %c0_i32 = arith.constant 0 : i32
    %c0_i32_0 = arith.constant 0 : i32
    return %arg0, %c0_i32 : i32, i32
  }
}

</mosaic_0001>

<bundles_post_ra>
// kernel: _minerva_forward_impl.1
= control target key start
LH: loop header
LB: loop body
LE: loop exit
PB: predicated region body
PF: predicated region fallthrough
CT: control target
= control target key end

     0   :  { %v389_v1 = vmov 0.0   ;;  %vm390_vm0 = vmmov 0   ;;  %s495_s0 = inlined_call_operand.vmem [shape: bf16[8,128], index: 0, kind: input, shape index: {}]   ;;  %s496_s1 = inlined_call_operand.vmem [shape: bf16[16,128], index: 1, kind: input, shape index: {}]   ;;  %s497_s2 = inlined_call_operand.vmem [shape: bf16[16,128], index: 2, kind: input, shape index: {}]   ;;  %s498_s3 = inlined_call_operand.vmem [shape: f32[128,128], index: 3, kind: input, shape index: {}]   ;;  %s499_s4 = inlined_call_operand.vmem [shape: f32[1,128], index: 4, kind: input, shape index: {}]   ;;  %s500_s5 = inlined_call_operand.hbm [shape: f32[8,128], index: 5, kind: output, shape index: {}]  }
   0x1   :  { %v361_v0 = vld [vmem:[%s496_s1] sm:$0xff]   ;;  %286 = vmatprep.subr.bf16.mxu0 %v389_v1  ;;  %288 = vmatprep.mubr.msk.bf16.mxu0 %vm390_vm0, %v389_v1 }
   0x2   :  { %287 = vmatpush3.bf16.xpose.msra.mxu0 %v361_v0 }
   0x3   :  { %10 = vsyncpa [#allocation4], 0  ;;  %292 = vmatprep.subr.bf16.mxu0 %v389_v1  ;;  %330 = vmatprep.mubr.msk.f32.mxu1 %vm390_vm0, %v389_v1  ;;  %v27_v2 = vld [vmem:[%s495_s0] sm:$0xf]  ;;  %v142_v5 = vld [vmem:[%s498_s3 + $0x8] sm:$0xff]  ;;  %v391_v6 = vmov 0.0|0.0  }
   0x4   :  { %v362_v3 = vld [vmem:[%s497_s2] sm:$0xff]   ;;  %333 = vmatprep.subr.bf16.mxu1 %v391_v6  ;;  %v143_v8 = vld [vmem:[%s498_s3 + $0x10] sm:$0xff]  ;;  %v144_v9 = vld [vmem:[%s498_s3 + $0x18] sm:$0xff]  ;;  %vm88_vm1 = vcmask 130048   ;;  %s392_s27 = smov [#allocation3]  }
   0x5   :  { %v141_v4 = vld [vmem:[%s498_s3] sm:$0xff]  ;;  %v337_v10 = vpack.c.bf16 %v144_v9, %v143_v8  ;;  %v146_v12 = vld [vmem:[%s498_s3 + $0x28] sm:$0xff]  ;;  %v147_v14 = vld [vmem:[%s498_s3 + $0x30] sm:$0xff]  ;;  %s253_s2 = sshll.u32 %s392_s27, 4  ;;  %s254_s2 = int_to_ptr.vmem [resolvable:$true] %s253_s2 }
   0x6   :  { %v334_v7 = vpack.c.bf16 %v142_v5, %v141_v4  ;;  %v145_v11 = vld [vmem:[%s498_s3 + $0x20] sm:$0xff]  ;;  %v148_v15 = vld [vmem:[%s498_s3 + $0x38] sm:$0xff]  ;;  %v150_v18 = vld [vmem:[%s498_s3 + $0x48] sm:$0xff]  ;;  %p370_p1 = scmp.lt.s32.totalorder %s254_s2, %s254_s2 }
   0x7   :  { %v340_v13 = vpack.c.bf16 %v146_v12, %v145_v11  ;;  %v343_v16 = vpack.c.bf16 %v148_v15, %v147_v14  ;;  %v149_v17 = vld [vmem:[%s498_s3 + $0x40] sm:$0xff]  ;;  %v151_v20 = vld [vmem:[%s498_s3 + $0x50] sm:$0xff]  ;;  %v152_v21 = vld [vmem:[%s498_s3 + $0x58] sm:$0xff] }
   0x8   :  { %335 = vmatpush3.bf16.xpose.msra.mxu1 %v334_v7  ;;  %v346_v19 = vpack.c.bf16 %v150_v18, %v149_v17  ;;  %v349_v22 = vpack.c.bf16 %v152_v21, %v151_v20  ;;  %v153_v23 = vld [vmem:[%s498_s3 + $0x60] sm:$0xff]  ;;  %v154_v24 = vld [vmem:[%s498_s3 + $0x68] sm:$0xff]  ;;  %v155_v26 = vld [vmem:[%s498_s3 + $0x70] sm:$0xff] }
   0x9   :  { %289 = vmatmul.mubr.bf16.vlgmr.msra.gmra.mrb[0].mxu0 %v27_v2  ;;  %336 = vmatprep.subr.bf16.mxu1 %v391_v6  ;;  %v352_v25 = vpack.c.bf16 %v154_v24, %v153_v23  ;;  %v156_v27 = vld [vmem:[%s498_s3 + $0x78] sm:$0xff]  ;;  %v264_v42 = vld [vmem:[%s499_s4] ss:$0 sm:$0xff]  ;;  %s365_s4 = scalar_lea.vmem %s254_s2, 128 }
   0xa   :  { %293 = vmatpush3.bf16.msra.mxu0 %v362_v3  ;;  %294 = vmatprep.mubr.msk.bf16.mxu0 %vm390_vm0, %v389_v1  ;;  %v355_v28 = vpack.c.bf16 %v156_v27, %v155_v26  ;;  %p366_p0 = scmp.ne.s32.totalorder %s254_s2, %s365_s4  ;;  %p371_p2 = scmp.lt.s32.totalorder %s365_s4, %s365_s4 }
   0xc   :  { %p372_p3 = por %p371_p2, %p370_p1 }
   0xe   :  { %p373_p4 = pnand %p372_p3, %p366_p0 }
  0x10   :  { %338 = vmatpush3.bf16.xpose.msra.mxu1 %v337_v10 }
  0x11   :  { %339 = vmatprep.subr.bf16.mxu1 %v391_v6 }
  0x18   :  { %341 = vmatpush3.bf16.xpose.msra.mxu1 %v340_v13 }
  0x19   :  { %342 = vmatprep.subr.bf16.mxu1 %v391_v6 }
  0x20   :  { %344 = vmatpush3.bf16.xpose.msra.mxu1 %v343_v16 }
  0x21   :  { %345 = vmatprep.subr.bf16.mxu1 %v391_v6 }
  0x28   :  { %347 = vmatpush3.bf16.xpose.msra.mxu1 %v346_v19 }
  0x29   :  { %348 = vmatprep.subr.bf16.mxu1 %v391_v6 }
  0x30   :  { %350 = vmatpush3.bf16.xpose.msra.mxu1 %v349_v22 }
  0x31   :  { %351 = vmatprep.subr.bf16.mxu1 %v391_v6 }
  0x38   :  { %353 = vmatpush3.bf16.xpose.msra.mxu1 %v352_v25 }
  0x39   :  { %354 = vmatprep.subr.bf16.mxu1 %v391_v6 }
  0x40   :  { %356 = vmatpush3.bf16.xpose.msra.mxu1 %v355_v28 }
  0xdc   :  { %v70_v29 = vpop.f32.mrb[0].mxu0 }
  0xdd   :  { %v76_v30 = vmul.f32 %v70_v29, %v70_v29  ;;  %v290_v31 = vpop.f32.mrb[1].mxu0 }
  0xde   :  { %v73_v32 = vpop.f32.mrb[2].mxu0 }
  0xdf   :  { %v77_v33 = vmul.f32 %v76_v30, %v70_v29  ;;  %v291_v34 = vpop.f32.mrb[3].mxu0 }
  0xe1   :  { %v79_v35 = vpack.c.bf16 %v77_v33, %v77_v33 }
  0xe3   :  { %295 = vmatmul.mubr.msk.bf16.vlgmr.msra.gmra.mrb[4].mxu0 %vm88_vm1, %v79_v35 }
 0x1b6   :  { %v126_v36 = vpop.f32.mrb[4].mxu0 }
 0x1b7   :  { %v296_v37 = vpop.f32.mrb[5].mxu0  ;;  %331 = vmatmul.mubr.f32.vlgmr.msra.gmra.mrb[0].mxu1 %v126_v36  ;;  %v138_v38 = vmul.f32 %v126_v36, %v126_v36 }
 0x1b8   :  { %v129_v39 = vpop.f32.mrb[6].mxu0 }
 0x1b9   :  { %v297_v40 = vpop.f32.mrb[7].mxu0  ;;  %139 = vadd.xlane.f32.xlu0 %v138_v38 }
 0x246   :  { %v140_v41 = vpop.xlane.xlu0 %139 }
 0x247   :  { %v234_v44 = vadd.f32 %v264_v42, %v140_v41 }
 0x28a   :  { %v223_v43 = vpop.f32.mrb[0].mxu1 }
 0x28b   :  { %v235_v45 = vmul.f32 2.0, %v223_v43  ;;  %v332_v46 = vpop.f32.mrb[1].mxu1 }
 0x28d   :  { %v236_v47 = vsub.f32 %v234_v44, %v235_v45 }
 0x28f   :  { %v237_v48 = vmax.f32 %v236_v47, 0.0 }
 0x291   :  { %363 = vrsqrt.f32 %v237_v48  ;;  %vm240_vm2 = vcmp.eq.f32.partialorder %v237_v48, inf  ;;  %v243_v51 = vand.u32 2147483648, %v237_v48  ;;  %vm242_vm3 = vcmp.eq.f32.partialorder %v237_v48, 0.0 }
 0x29b   :  { %v364_v49 = vpop.eup %363 }
 0x29c   :  { %v239_v50 = vmul.f32 %v364_v49, %v237_v48 }
 0x29e   :  { %v241_v52 = vsel %vm240_vm2, %v237_v48, %v239_v50 }
 0x29f   :  { %v244_v53 = vsel %vm242_vm3, %v243_v51, %v241_v52 }
 0x2a0   :  { %v245_v54 = vsub.f32 0.0, %v244_v53 }
 0x2a2   :  { %246 = vst [vmem:[#allocation3] sm:$0xff] %v245_v54 }
 0x2a3   :  { %376 = shalt.err (!%p373_p4)
}
 0x2a4   :  { %s377_s30 = scalar_lea.hbm %s500_s5, 128 }
 0x2a5   :  { %p378_p5 = scmp.ne.s32.totalorder %s500_s5, %s377_s30  ;;  %p381_p6 = scmp.lt.u32.totalorder %s377_s30, %s500_s5 }
 0x2a7   :  { %p383_p7 = pnand %p381_p6, %p378_p5 }
 0x2a9   :  { %386 = shalt.err (!%p383_p7)
}
 0x2aa   :  { %256 = dma.vmem_to_hbm [thread:$0]  %s254_s2, 128, %s500_s5, [#allocation4]  }
 0x2ab   :  { %387 = dma.done.wait [#allocation4], 128  }
 0x2ac   :  { %388 = vsyncadd [#allocation4], 4294967168 }
 0x2ad   :  { %260 = vsyncpa [#allocation4], 1 }

// kernel: _minerva_forward_impl.1
= control target key start
LH: loop header
LB: loop body
LE: loop exit
PB: predicated region body
PF: predicated region fallthrough
CT: control target
= control target key end

     0   :  { %v389_v1 = vmov 0.0   ;;  %vm390_vm0 = vmmov 0   ;;  %s495_s0 = inlined_call_operand.vmem [shape: bf16[8,128], index: 0, kind: input, shape index: {}]   ;;  %s496_s1 = inlined_call_operand.vmem [shape: bf16[16,128], index: 1, kind: input, shape index: {}]   ;;  %s497_s2 = inlined_call_operand.vmem [shape: bf16[16,128], index: 2, kind: input, shape index: {}]   ;;  %s498_s3 = inlined_call_operand.vmem [shape: f32[128,128], index: 3, kind: input, shape index: {}]   ;;  %s499_s4 = inlined_call_operand.vmem [shape: f32[1,128], index: 4, kind: input, shape index: {}]   ;;  %s500_s5 = inlined_call_operand.hbm [shape: f32[8,128], index: 5, kind: output, shape index: {}]  }
   0x1   :  { %v361_v0 = vld [vmem:[%s496_s1] sm:$0xff]   ;;  %286 = vmatprep.subr.bf16.mxu0 %v389_v1  ;;  %288 = vmatprep.mubr.msk.bf16.mxu0 %vm390_vm0, %v389_v1 }
   0x2   :  { %287 = vmatpush3.bf16.xpose.msra.mxu0 %v361_v0 }
   0x3   :  { %10 = vsyncpa [#allocation4], 0  ;;  %292 = vmatprep.subr.bf16.mxu0 %v389_v1  ;;  %330 = vmatprep.mubr.msk.f32.mxu1 %vm390_vm0, %v389_v1  ;;  %v27_v2 = vld [vmem:[%s495_s0] sm:$0xf]  ;;  %v142_v5 = vld [vmem:[%s498_s3 + $0x8] sm:$0xff]  ;;  %v391_v6 = vmov 0.0|0.0  }
   0x4   :  { %v362_v3 = vld [vmem:[%s497_s2] sm:$0xff]   ;;  %333 = vmatprep.subr.bf16.mxu1 %v391_v6  ;;  %v143_v8 = vld [vmem:[%s498_s3 + $0x10] sm:$0xff]  ;;  %v144_v9 = vld [vmem:[%s498_s3 + $0x18] sm:$0xff]  ;;  %vm88_vm1 = vcmask 130048   ;;  %s392_s27 = smov [#allocation3]  }
   0x5   :  { %v141_v4 = vld [vmem:[%s498_s3] sm:$0xff]  ;;  %v337_v10 = vpack.c.bf16 %v144_v9, %v143_v8  ;;  %v146_v12 = vld [vmem:[%s498_s3 + $0x28] sm:$0xff]  ;;  %v147_v14 = vld [vmem:[%s498_s3 + $0x30] sm:$0xff]  ;;  %s253_s2 = sshll.u32 %s392_s27, 4  ;;  %s254_s2 = int_to_ptr.vmem [resolvable:$true] %s253_s2 }
   0x6   :  { %v334_v7 = vpack.c.bf16 %v142_v5, %v141_v4  ;;  %v145_v11 = vld [vmem:[%s498_s3 + $0x20] sm:$0xff]  ;;  %v148_v15 = vld [vmem:[%s498_s3 + $0x38] sm:$0xff]  ;;  %v150_v18 = vld [vmem:[%s498_s3 + $0x48] sm:$0xff]  ;;  %p370_p1 = scmp.lt.s32.totalorder %s254_s2, %s254_s2 }
   0x7   :  { %v340_v13 = vpack.c.bf16 %v146_v12, %v145_v11  ;;  %v343_v16 = vpack.c.bf16 %v148_v15, %v147_v14  ;;  %v149_v17 = vld [vmem:[%s498_s3 + $0x40] sm:$0xff]  ;;  %v151_v20 = vld [vmem:[%s498_s3 + $0x50] sm:$0xff]  ;;  %v152_v21 = vld [vmem:[%s498_s3 + $0x58] sm:$0xff] }
   0x8   :  { %335 = vmatpush3.bf16.xpose.msra.mxu1 %v334_v7  ;;  %v346_v19 = vpack.c.bf16 %v150_v18, %v149_v17  ;;  %v349_v22 = vpack.c.bf16 %v152_v21, %v151_v20  ;;  %v153_v23 = vld [vmem:[%s498_s3 + $0x60] sm:$0xff]  ;;  %v154_v24 = vld [vmem:[%s498_s3 + $0x68] sm:$0xff]  ;;  %v155_v26 = vld [vmem:[%s498_s3 + $0x70] sm:$0xff] }
   0x9   :  { %289 = vmatmul.mubr.bf16.vlgmr.msra.gmra.mrb[0].mxu0 %v27_v2  ;;  %336 = vmatprep.subr.bf16.mxu1 %v391_v6  ;;  %v352_v25 = vpack.c.bf16 %v154_v24, %v153_v23  ;;  %v156_v27 = vld [vmem:[%s498_s3 + $0x78] sm:$0xff]  ;;  %v264_v42 = vld [vmem:[%s499_s4] ss:$0 sm:$0xff]  ;;  %s365_s4 = scalar_lea.vmem %s254_s2, 128 }
   0xa   :  { %293 = vmatpush3.bf16.msra.mxu0 %v362_v3  ;;  %294 = vmatprep.mubr.msk.bf16.mxu0 %vm390_vm0, %v389_v1  ;;  %v355_v28 = vpack.c.bf16 %v156_v27, %v155_v26  ;;  %p366_p0 = scmp.ne.s32.totalorder %s254_s2, %s365_s4  ;;  %p371_p2 = scmp.lt.s32.totalorder %s365_s4, %s365_s4 }
   0xc   :  { %p372_p3 = por %p371_p2, %p370_p1 }
   0xe   :  { %p373_p4 = pnand %p372_p3, %p366_p0 }
  0x10   :  { %338 = vmatpush3.bf16.xpose.msra.mxu1 %v337_v10 }
  0x11   :  { %339 = vmatprep.subr.bf16.mxu1 %v391_v6 }
  0x18   :  { %341 = vmatpush3.bf16.xpose.msra.mxu1 %v340_v13 }
  0x19   :  { %342 = vmatprep.subr.bf16.mxu1 %v391_v6 }
  0x20   :  { %344 = vmatpush3.bf16.xpose.msra.mxu1 %v343_v16 }
  0x21   :  { %345 = vmatprep.subr.bf16.mxu1 %v391_v6 }
  0x28   :  { %347 = vmatpush3.bf16.xpose.msra.mxu1 %v346_v19 }
  0x29   :  { %348 = vmatprep.subr.bf16.mxu1 %v391_v6 }
  0x30   :  { %350 = vmatpush3.bf16.xpose.msra.mxu1 %v349_v22 }
  0x31   :  { %351 = vmatprep.subr.bf16.mxu1 %v391_v6 }
  0x38   :  { %353 = vmatpush3.bf16.xpose.msra.mxu1 %v352_v25 }
  0x39   :  { %354 = vmatprep.subr.bf16.mxu1 %v391_v6 }
  0x40   :  { %356 = vmatpush3.bf16.xpose.msra.mxu1 %v355_v28 }
  0xdc   :  { %v70_v29 = vpop.f32.mrb[0].mxu0 }
  0xdd   :  { %v76_v30 = vmul.f32 %v70_v29, %v70_v29  ;;  %v290_v31 = vpop.f32.mrb[1].mxu0 }
  0xde   :  { %v73_v32 = vpop.f32.mrb[2].mxu0 }
  0xdf   :  { %v77_v33 = vmul.f32 %v76_v30, %v70_v29  ;;  %v291_v34 = vpop.f32.mrb[3].mxu0 }
  0xe1   :  { %v79_v35 = vpack.c.bf16 %v77_v33, %v77_v33 }
  0xe3   :  { %295 = vmatmul.mubr.msk.bf16.vlgmr.msra.gmra.mrb[4].mxu0 %vm88_vm1, %v79_v35 }
 0x1b6   :  { %v126_v36 = vpop.f32.mrb[4].mxu0 }
 0x1b7   :  { %v296_v37 = vpop.f32.mrb[5].mxu0  ;;  %331 = vmatmul.mubr.f32.vlgmr.msra.gmra.mrb[0].mxu1 %v126_v36  ;;  %v138_v38 = vmul.f32 %v126_v36, %v126_v36 }
 0x1b8   :  { %v129_v39 = vpop.f32.mrb[6].mxu0 }
 0x1b9   :  { %v297_v40 = vpop.f32.mrb[7].mxu0  ;;  %139 = vadd.xlane.f32.xlu0 %v138_v38 }
 0x246   :  { %v140_v41 = vpop.xlane.xlu0 %139 }
 0x247   :  { %v234_v44 = vadd.f32 %v264_v42, %v140_v41 }
 0x28a   :  { %v223_v43 = vpop.f32.mrb[0].mxu1 }
 0x28b   :  { %v235_v45 = vmul.f32 2.0, %v223_v43  ;;  %v332_v46 = vpop.f32.mrb[1].mxu1 }
 0x28d   :  { %v236_v47 = vsub.f32 %v234_v44, %v235_v45 }
 0x28f   :  { %v237_v48 = vmax.f32 %v236_v47, 0.0 }
 0x291   :  { %363 = vrsqrt.f32 %v237_v48  ;;  %vm240_vm2 = vcmp.eq.f32.partialorder %v237_v48, inf  ;;  %v243_v51 = vand.u32 2147483648, %v237_v48  ;;  %vm242_vm3 = vcmp.eq.f32.partialorder %v237_v48, 0.0 }
 0x29b   :  { %v364_v49 = vpop.eup %363 }
 0x29c   :  { %v239_v50 = vmul.f32 %v364_v49, %v237_v48 }
 0x29e   :  { %v241_v52 = vsel %vm240_vm2, %v237_v48, %v239_v50 }
 0x29f   :  { %v244_v53 = vsel %vm242_vm3, %v243_v51, %v241_v52 }
 0x2a0   :  { %v245_v54 = vsub.f32 0.0, %v244_v53 }
 0x2a2   :  { %246 = vst [vmem:[#allocation3] sm:$0xff] %v245_v54 }
 0x2a3   :  { %376 = shalt.err (!%p373_p4)
}
 0x2a4   :  { %s377_s30 = scalar_lea.hbm %s500_s5, 128 }
 0x2a5   :  { %p378_p5 = scmp.ne.s32.totalorder %s500_s5, %s377_s30  ;;  %p381_p6 = scmp.lt.u32.totalorder %s377_s30, %s500_s5 }
 0x2a7   :  { %p383_p7 = pnand %p381_p6, %p378_p5 }
 0x2a9   :  { %386 = shalt.err (!%p383_p7)
}
 0x2aa   :  { %256 = dma.vmem_to_hbm [thread:$0]  %s254_s2, 128, %s500_s5, [#allocation4]  }
 0x2ab   :  { %387 = dma.done.wait [#allocation4], 128  }
 0x2ac   :  { %388 = vsyncadd [#allocation4], 4294967168 }
 0x2ad   :  { %260 = vsyncpa [#allocation4], 1 }

</bundles_post_ra>
